<compile_context>
chip_gen: v7x
topology: tpu7x:2x2x1
jax: 0.10.0
libtpu: 0.0.40
codegen_flags: <defaults>
</compile_context>

<pallas_src>
import functools

import jax
import jax.numpy as jnp
from jax.experimental import pallas as pl
from jax.experimental.pallas import tpu as pltpu

_LANE = 128


def _round_up(v, m):
    return ((v + m - 1) // m) * m


@functools.lru_cache(maxsize=1)
def _vmem_limit_bytes():
    """Generation-aware VMEM budget (v7x: 64 MiB physical, v5e/v6e: 128 MiB)."""
    try:
        cap = int(pltpu.get_tpu_info().vmem_capacity_bytes)
    except Exception:  # interpret mode / info unavailable -> conservative
        cap = 64 << 20
    return int(min(cap // 2, 64 << 20))


# ----------------------------------------------------------------------------
# Parameter packing: 2 contiguous buffers + static per-layer plan
# ----------------------------------------------------------------------------
def pack_params(params, weight_dtype=jnp.bfloat16):
    """Pad every layer to a lane-dense (PAD, PAD) tile and stack all layers into
    two contiguous buffers so the kernel sees 3 large DMAs instead of ~21 tiny
    ones.  Returns (w_packed, v_packed, cfg) with cfg a static layer plan."""
    enc, dec = params["encoder"], params["decoder"]
    dim = len(enc)

    layers = []
    # Encoder: Linear(+BN+ReLU) for all but the last; last is Linear+Softmax.
    for i, (w, b, g, bt) in enumerate(enc):
        last = i == dim - 1
        layers.append((w, b, g, bt, not last, not last, last, last))
    # Decoder: Linear+BN+ReLU for every layer.
    for (w, b, g, bt) in dec:
        layers.append((w, b, g, bt, True, True, False, False))

    max_dim = max(max(w.shape) for (w, *_r) in layers)
    pad = _round_up(max(max_dim, _LANE), _LANE)
    num_layers = len(layers)

    w_packed = jnp.zeros((num_layers, pad, pad), weight_dtype)
    v_packed = jnp.zeros((num_layers, 2, pad), jnp.float32)
    cfg = []
    for l, (w, b, g, bt, bn, relu, softmax, is_latent) in enumerate(layers):
        di, do = w.shape
        w_packed = w_packed.at[l, :di, :do].set(w.astype(weight_dtype))
        if bn:
            # Bias cancels exactly against BN's batch-mean subtraction ->
            # drop it; only gamma/beta travel for BN layers.
            v_packed = v_packed.at[l, 0, :do].set(jnp.reshape(g, (-1,)))
            v_packed = v_packed.at[l, 1, :do].set(jnp.reshape(bt, (-1,)))
        else:
            v_packed = v_packed.at[l, 0, :do].set(jnp.reshape(b, (-1,)))
        cfg.append((bool(bn), bool(relu), bool(softmax), bool(is_latent), int(do)))
    return w_packed, v_packed, tuple(cfg)


# ----------------------------------------------------------------------------
# Fused kernel
# ----------------------------------------------------------------------------
def _make_fused_kernel(cfg, eps):
    def kernel(x_ref, w_ref, vec_ref, x_hat_ref, latent_ref):
        h = x_ref[...]                                  # (n, PAD) f32, lane-dense
        latent = None
        for l, (has_bn, has_relu, has_softmax, is_latent, out_dim) in enumerate(cfg):
            w = w_ref[l]                                # (PAD, PAD) bf16
            vecs = vec_ref[l]                           # (2, PAD) f32
            # MXU matmul: bf16 inputs, f32 accumulation.
            y = jnp.dot(h.astype(w.dtype), w, preferred_element_type=jnp.float32)
            if has_bn:
                gamma, beta = vecs[0:1, :], vecs[1:2, :]
                mean = jnp.mean(y, axis=0, keepdims=True)
                c = y - mean                            # linear bias cancels here
                var = jnp.mean(c * c, axis=0, keepdims=True)   # centered: stable
                y = c * (gamma * jax.lax.rsqrt(var + eps)) + beta  # rsqrt -> EUP
            else:
                y = y + vecs[0:1, :]                    # bias only on no-BN layer
            if has_relu:
                y = jnp.maximum(y, 0.0)
            if has_softmax:
                # Row-wise softmax over the real features only: padded lanes are
                # masked to -inf so they contribute exp(.) = 0.
                lane = jax.lax.broadcasted_iota(jnp.int32, y.shape, 1)
                y = jnp.where(lane < out_dim, y, -jnp.inf)
                m = jnp.max(y, axis=1, keepdims=True)
                e = jnp.exp(y - m)
                y = e / jnp.sum(e, axis=1, keepdims=True)   # EXACT normalization
            h = y
            if is_latent:
                latent = h
        # Full 128-lane stores -> unmasked vst; padding sliced off in wrapper.
        x_hat_ref[...] = h.astype(x_hat_ref.dtype)
        latent_ref[...] = latent.astype(latent_ref.dtype)
    return kernel


# ----------------------------------------------------------------------------
# Forward
# ----------------------------------------------------------------------------
@functools.partial(jax.jit, static_argnames=("cfg", "eps"))
def _fused_forward(x, w_packed, v_packed, *, cfg, eps):
    n, feat_dim = x.shape
    pad = w_packed.shape[-1]
    latent_dim = next(od for (_, _, _, is_lat, od) in cfg if is_lat)

    # Lane-dense input: zero-pad features to the 128-lane tile.
    x_pad = jnp.zeros((n, pad), jnp.float32).at[:, :feat_dim].set(
        x.astype(jnp.float32))

    vmem = pl.BlockSpec(memory_space=pltpu.MemorySpace.VMEM)
    kernel = _make_fused_kernel(cfg, eps)
    x_hat_pad, latent_pad = pl.pallas_call(
        kernel,
        out_shape=(
            jax.ShapeDtypeStruct((n, pad), jnp.float32),
            jax.ShapeDtypeStruct((n, pad), jnp.float32),
        ),
        in_specs=[vmem, vmem, vmem],
        out_specs=(vmem, vmem),
        compiler_params=pltpu.CompilerParams(
            vmem_limit_bytes=_vmem_limit_bytes()),
    )(x_pad, w_packed, v_packed)

    return x_hat_pad[:, :feat_dim], latent_pad[:, :latent_dim]


def autoencoder_forward(x, packed, *, eps=1e-5):
    """Returns (x_hat, latent), matching the PyTorch module's forward."""
    w_packed, v_packed, cfg = packed
    return _fused_forward(x, w_packed, v_packed, cfg=cfg, eps=float(eps))


# ----------------------------------------------------------------------------
# Parameter init (PyTorch-like)
# ----------------------------------------------------------------------------
def init_linear(key, in_dim, out_dim):
    """PyTorch-like init: U(-1/sqrt(in), 1/sqrt(in)); BN gamma=1, beta=0."""
    kw, kb = jax.random.split(key)
    bound = 1.0 / jnp.sqrt(jnp.float32(in_dim))
    w = jax.random.uniform(kw, (in_dim, out_dim), jnp.float32, -bound, bound)
    b = jax.random.uniform(kb, (1, out_dim), jnp.float32, -bound, bound)
    gamma = jnp.ones((1, out_dim), jnp.float32)
    beta = jnp.zeros((1, out_dim), jnp.float32)
    return (w, b, gamma, beta)


def init_autoencoder_params(key, encoder_dim):
    dim = len(encoder_dim) - 1
    decoder_dim = list(reversed(encoder_dim))
    keys = jax.random.split(key, 2 * dim)
    enc = [init_linear(keys[i], encoder_dim[i], encoder_dim[i + 1])
           for i in range(dim)]
    dec = [init_linear(keys[dim + i], decoder_dim[i], decoder_dim[i + 1])
           for i in range(dim)]
    return {"encoder": enc, "decoder": dec}


if __name__ == "__main__":
    key = jax.random.PRNGKey(0)
    k_x, k_p = jax.random.split(key)

    # Small shapes consistent with the module: x is [num, feat_dim].
    num = 8
    encoder_dim = [64, 32, 16]   # feat_dim=64, latent_dim=16
    x = jax.random.normal(k_x, (num, encoder_dim[0]), jnp.float32)

    params = init_autoencoder_params(k_p, encoder_dim)
    packed = pack_params(params)            # pack/pad once, reuse per call

    x_hat, latent = autoencoder_forward(x, packed)
    jax.block_until_ready((x_hat, latent))

    assert x_hat.shape == (num, encoder_dim[0])
    assert latent.shape == (num, encoder_dim[-1])
    # Softmax rows of the latent must sum to 1 (exact normalization in-kernel).
    assert jnp.allclose(jnp.sum(latent, axis=1), 1.0, atol=1e-4)
    assert bool(jnp.all(jnp.isfinite(x_hat)))

    print("KERNEL_OK")
</pallas_src>

<mosaic_0001>
module attributes {stable_mosaic.version = 11 : i64} {
  func.func @kernel(%arg0: memref<8x128xf32, #tpu.memory_space<vmem>>, %arg1: memref<4x128x128xbf16, #tpu.memory_space<vmem>>, %arg2: memref<4x2x128xf32, #tpu.memory_space<vmem>>, %arg3: memref<8x128xf32, #tpu.memory_space<vmem>>, %arg4: memref<8x128xf32, #tpu.memory_space<vmem>>) attributes {dimension_semantics = [], scalar_prefetch = 0 : i64, scratch_operands = 0 : i64, tpu.core_type = #tpu.core_type<tc>} {
    %c0 = arith.constant 0 : index
    %c0_0 = arith.constant 0 : index
    %0 = vector.load %arg0[%c0, %c0_0] : memref<8x128xf32, #tpu.memory_space<vmem>>, vector<8x128xf32>
    %c0_1 = arith.constant 0 : index
    %c0_2 = arith.constant 0 : index
    %c0_3 = arith.constant 0 : index
    %1 = vector.load %arg1[%c0_1, %c0_2, %c0_3] : memref<4x128x128xbf16, #tpu.memory_space<vmem>>, vector<1x128x128xbf16>
    %2 = vector.shape_cast %1 : vector<1x128x128xbf16> to vector<128x128xbf16>
    %c0_4 = arith.constant 0 : index
    %c0_5 = arith.constant 0 : index
    %c0_6 = arith.constant 0 : index
    %3 = vector.load %arg2[%c0_4, %c0_5, %c0_6] : memref<4x2x128xf32, #tpu.memory_space<vmem>>, vector<1x2x128xf32>
    %4 = vector.shape_cast %3 : vector<1x2x128xf32> to vector<2x128xf32>
    %5 = arith.truncf %0 : vector<8x128xf32> to vector<8x128xbf16>
    %cst = arith.constant dense<0.000000e+00> : vector<8x128xf32>
    %6 = tpu.matmul %5, %2, %cst {dimension_numbers = #tpu.dot_dimension_numbers<[1], [0], [0], [1], [0, 0, 1, 1], [], []>} : vector<8x128xbf16>, vector<128x128xbf16>, vector<8x128xf32> -> vector<8x128xf32>
    %7 = vector.extract_strided_slice %4 {offsets = [0, 0], sizes = [1, 128], strides = [1, 1]} : vector<2x128xf32> to vector<1x128xf32>
    %8 = vector.extract_strided_slice %4 {offsets = [1, 0], sizes = [1, 128], strides = [1, 1]} : vector<2x128xf32> to vector<1x128xf32>
    %cst_7 = arith.constant dense<0.000000e+00> : vector<128xf32>
    %9 = vector.multi_reduction <add>, %6, %cst_7 [0] : vector<8x128xf32> to vector<128xf32>
    %10 = vector.shape_cast %9 : vector<128xf32> to vector<1x128xf32>
    %cst_8 = arith.constant 8.000000e+00 : f32
    %11 = vector.broadcast %cst_8 : f32 to vector<1x128xf32>
    %12 = arith.divf %10, %11 : vector<1x128xf32>
    %13 = vector.broadcast %12 : vector<1x128xf32> to vector<8x128xf32>
    %14 = arith.subf %6, %13 : vector<8x128xf32>
    %15 = arith.mulf %14, %14 : vector<8x128xf32>
    %cst_9 = arith.constant dense<0.000000e+00> : vector<128xf32>
    %16 = vector.multi_reduction <add>, %15, %cst_9 [0] : vector<8x128xf32> to vector<128xf32>
    %17 = vector.shape_cast %16 : vector<128xf32> to vector<1x128xf32>
    %cst_10 = arith.constant 8.000000e+00 : f32
    %18 = vector.broadcast %cst_10 : f32 to vector<1x128xf32>
    %19 = arith.divf %17, %18 : vector<1x128xf32>
    %cst_11 = arith.constant 9.99999974E-6 : f32
    %20 = vector.broadcast %cst_11 : f32 to vector<1x128xf32>
    %21 = arith.addf %19, %20 : vector<1x128xf32>
    %22 = math.rsqrt %21 : vector<1x128xf32>
    %23 = arith.mulf %7, %22 : vector<1x128xf32>
    %24 = vector.broadcast %23 : vector<1x128xf32> to vector<8x128xf32>
    %25 = arith.mulf %14, %24 : vector<8x128xf32>
    %26 = vector.broadcast %8 : vector<1x128xf32> to vector<8x128xf32>
    %27 = arith.addf %25, %26 : vector<8x128xf32>
    %cst_12 = arith.constant 0.000000e+00 : f32
    %28 = vector.broadcast %cst_12 : f32 to vector<8x128xf32>
    %29 = arith.maximumf %27, %28 : vector<8x128xf32>
    %c1 = arith.constant 1 : index
    %c0_13 = arith.constant 0 : index
    %c0_14 = arith.constant 0 : index
    %30 = vector.load %arg1[%c1, %c0_13, %c0_14] : memref<4x128x128xbf16, #tpu.memory_space<vmem>>, vector<1x128x128xbf16>
    %31 = vector.shape_cast %30 : vector<1x128x128xbf16> to vector<128x128xbf16>
    %c1_15 = arith.constant 1 : index
    %c0_16 = arith.constant 0 : index
    %c0_17 = arith.constant 0 : index
    %32 = vector.load %arg2[%c1_15, %c0_16, %c0_17] : memref<4x2x128xf32, #tpu.memory_space<vmem>>, vector<1x2x128xf32>
    %33 = vector.shape_cast %32 : vector<1x2x128xf32> to vector<2x128xf32>
    %34 = arith.truncf %29 : vector<8x128xf32> to vector<8x128xbf16>
    %cst_18 = arith.constant dense<0.000000e+00> : vector<8x128xf32>
    %35 = tpu.matmul %34, %31, %cst_18 {dimension_numbers = #tpu.dot_dimension_numbers<[1], [0], [0], [1], [0, 0, 1, 1], [], []>} : vector<8x128xbf16>, vector<128x128xbf16>, vector<8x128xf32> -> vector<8x128xf32>
    %36 = vector.extract_strided_slice %33 {offsets = [0, 0], sizes = [1, 128], strides = [1, 1]} : vector<2x128xf32> to vector<1x128xf32>
    %37 = vector.broadcast %36 : vector<1x128xf32> to vector<8x128xf32>
    %38 = arith.addf %35, %37 : vector<8x128xf32>
    %39 = tpu.iota {dimensions = array<i32: 1>} : vector<8x128xi32>
    %c16_i32 = arith.constant 16 : i32
    %40 = vector.broadcast %c16_i32 : i32 to vector<8x128xi32>
    %41 = arith.cmpi slt, %39, %40 : vector<8x128xi32>
    %cst_19 = arith.constant 0xFF800000 : f32
    %42 = vector.broadcast %cst_19 : f32 to vector<8x128xf32>
    %43 = arith.select %41, %38, %42 : vector<8x128xi1>, vector<8x128xf32>
    %cst_20 = arith.constant dense<0xFF800000> : vector<8xf32>
    %44 = vector.multi_reduction <maximumf>, %43, %cst_20 [1] : vector<8x128xf32> to vector<8xf32>
    %45 = vector.shape_cast %44 : vector<8xf32> to vector<8x1xf32>
    %46 = vector.broadcast %45 : vector<8x1xf32> to vector<8x128xf32>
    %47 = arith.subf %43, %46 : vector<8x128xf32>
    %48 = math.exp %47 : vector<8x128xf32>
    %cst_21 = arith.constant dense<0.000000e+00> : vector<8xf32>
    %49 = vector.multi_reduction <add>, %48, %cst_21 [1] : vector<8x128xf32> to vector<8xf32>
    %50 = vector.shape_cast %49 : vector<8xf32> to vector<8x1xf32>
    %51 = vector.broadcast %50 : vector<8x1xf32> to vector<8x128xf32>
    %52 = arith.divf %48, %51 : vector<8x128xf32>
    %c2 = arith.constant 2 : index
    %c0_22 = arith.constant 0 : index
    %c0_23 = arith.constant 0 : index
    %53 = vector.load %arg1[%c2, %c0_22, %c0_23] : memref<4x128x128xbf16, #tpu.memory_space<vmem>>, vector<1x128x128xbf16>
    %54 = vector.shape_cast %53 : vector<1x128x128xbf16> to vector<128x128xbf16>
    %c2_24 = arith.constant 2 : index
    %c0_25 = arith.constant 0 : index
    %c0_26 = arith.constant 0 : index
    %55 = vector.load %arg2[%c2_24, %c0_25, %c0_26] : memref<4x2x128xf32, #tpu.memory_space<vmem>>, vector<1x2x128xf32>
    %56 = vector.shape_cast %55 : vector<1x2x128xf32> to vector<2x128xf32>
    %57 = arith.truncf %52 : vector<8x128xf32> to vector<8x128xbf16>
    %cst_27 = arith.constant dense<0.000000e+00> : vector<8x128xf32>
    %58 = tpu.matmul %57, %54, %cst_27 {dimension_numbers = #tpu.dot_dimension_numbers<[1], [0], [0], [1], [0, 0, 1, 1], [], []>} : vector<8x128xbf16>, vector<128x128xbf16>, vector<8x128xf32> -> vector<8x128xf32>
    %59 = vector.extract_strided_slice %56 {offsets = [0, 0], sizes = [1, 128], strides = [1, 1]} : vector<2x128xf32> to vector<1x128xf32>
    %60 = vector.extract_strided_slice %56 {offsets = [1, 0], sizes = [1, 128], strides = [1, 1]} : vector<2x128xf32> to vector<1x128xf32>
    %cst_28 = arith.constant dense<0.000000e+00> : vector<128xf32>
    %61 = vector.multi_reduction <add>, %58, %cst_28 [0] : vector<8x128xf32> to vector<128xf32>
    %62 = vector.shape_cast %61 : vector<128xf32> to vector<1x128xf32>
    %cst_29 = arith.constant 8.000000e+00 : f32
    %63 = vector.broadcast %cst_29 : f32 to vector<1x128xf32>
    %64 = arith.divf %62, %63 : vector<1x128xf32>
    %65 = vector.broadcast %64 : vector<1x128xf32> to vector<8x128xf32>
    %66 = arith.subf %58, %65 : vector<8x128xf32>
    %67 = arith.mulf %66, %66 : vector<8x128xf32>
    %cst_30 = arith.constant dense<0.000000e+00> : vector<128xf32>
    %68 = vector.multi_reduction <add>, %67, %cst_30 [0] : vector<8x128xf32> to vector<128xf32>
    %69 = vector.shape_cast %68 : vector<128xf32> to vector<1x128xf32>
    %cst_31 = arith.constant 8.000000e+00 : f32
    %70 = vector.broadcast %cst_31 : f32 to vector<1x128xf32>
    %71 = arith.divf %69, %70 : vector<1x128xf32>
    %cst_32 = arith.constant 9.99999974E-6 : f32
    %72 = vector.broadcast %cst_32 : f32 to vector<1x128xf32>
    %73 = arith.addf %71, %72 : vector<1x128xf32>
    %74 = math.rsqrt %73 : vector<1x128xf32>
    %75 = arith.mulf %59, %74 : vector<1x128xf32>
    %76 = vector.broadcast %75 : vector<1x128xf32> to vector<8x128xf32>
    %77 = arith.mulf %66, %76 : vector<8x128xf32>
    %78 = vector.broadcast %60 : vector<1x128xf32> to vector<8x128xf32>
    %79 = arith.addf %77, %78 : vector<8x128xf32>
    %cst_33 = arith.constant 0.000000e+00 : f32
    %80 = vector.broadcast %cst_33 : f32 to vector<8x128xf32>
    %81 = arith.maximumf %79, %80 : vector<8x128xf32>
    %c3 = arith.constant 3 : index
    %c0_34 = arith.constant 0 : index
    %c0_35 = arith.constant 0 : index
    %82 = vector.load %arg1[%c3, %c0_34, %c0_35] : memref<4x128x128xbf16, #tpu.memory_space<vmem>>, vector<1x128x128xbf16>
    %83 = vector.shape_cast %82 : vector<1x128x128xbf16> to vector<128x128xbf16>
    %c3_36 = arith.constant 3 : index
    %c0_37 = arith.constant 0 : index
    %c0_38 = arith.constant 0 : index
    %84 = vector.load %arg2[%c3_36, %c0_37, %c0_38] : memref<4x2x128xf32, #tpu.memory_space<vmem>>, vector<1x2x128xf32>
    %85 = vector.shape_cast %84 : vector<1x2x128xf32> to vector<2x128xf32>
    %86 = arith.truncf %81 : vector<8x128xf32> to vector<8x128xbf16>
    %cst_39 = arith.constant dense<0.000000e+00> : vector<8x128xf32>
    %87 = tpu.matmul %86, %83, %cst_39 {dimension_numbers = #tpu.dot_dimension_numbers<[1], [0], [0], [1], [0, 0, 1, 1], [], []>} : vector<8x128xbf16>, vector<128x128xbf16>, vector<8x128xf32> -> vector<8x128xf32>
    %88 = vector.extract_strided_slice %85 {offsets = [0, 0], sizes = [1, 128], strides = [1, 1]} : vector<2x128xf32> to vector<1x128xf32>
    %89 = vector.extract_strided_slice %85 {offsets = [1, 0], sizes = [1, 128], strides = [1, 1]} : vector<2x128xf32> to vector<1x128xf32>
    %cst_40 = arith.constant dense<0.000000e+00> : vector<128xf32>
    %90 = vector.multi_reduction <add>, %87, %cst_40 [0] : vector<8x128xf32> to vector<128xf32>
    %91 = vector.shape_cast %90 : vector<128xf32> to vector<1x128xf32>
    %cst_41 = arith.constant 8.000000e+00 : f32
    %92 = vector.broadcast %cst_41 : f32 to vector<1x128xf32>
    %93 = arith.divf %91, %92 : vector<1x128xf32>
    %94 = vector.broadcast %93 : vector<1x128xf32> to vector<8x128xf32>
    %95 = arith.subf %87, %94 : vector<8x128xf32>
    %96 = arith.mulf %95, %95 : vector<8x128xf32>
    %cst_42 = arith.constant dense<0.000000e+00> : vector<128xf32>
    %97 = vector.multi_reduction <add>, %96, %cst_42 [0] : vector<8x128xf32> to vector<128xf32>
    %98 = vector.shape_cast %97 : vector<128xf32> to vector<1x128xf32>
    %cst_43 = arith.constant 8.000000e+00 : f32
    %99 = vector.broadcast %cst_43 : f32 to vector<1x128xf32>
    %100 = arith.divf %98, %99 : vector<1x128xf32>
    %cst_44 = arith.constant 9.99999974E-6 : f32
    %101 = vector.broadcast %cst_44 : f32 to vector<1x128xf32>
    %102 = arith.addf %100, %101 : vector<1x128xf32>
    %103 = math.rsqrt %102 : vector<1x128xf32>
    %104 = arith.mulf %88, %103 : vector<1x128xf32>
    %105 = vector.broadcast %104 : vector<1x128xf32> to vector<8x128xf32>
    %106 = arith.mulf %95, %105 : vector<8x128xf32>
    %107 = vector.broadcast %89 : vector<1x128xf32> to vector<8x128xf32>
    %108 = arith.addf %106, %107 : vector<8x128xf32>
    %cst_45 = arith.constant 0.000000e+00 : f32
    %109 = vector.broadcast %cst_45 : f32 to vector<8x128xf32>
    %110 = arith.maximumf %108, %109 : vector<8x128xf32>
    %c0_46 = arith.constant 0 : index
    %c0_47 = arith.constant 0 : index
    %111 = vector.load %arg3[%c0_46, %c0_47] : memref<8x128xf32, #tpu.memory_space<vmem>>, vector<8x128xf32>
    tpu.vector_store %arg3[%c0_46, %c0_47], %110 {strides = array<i32>} : memref<8x128xf32, #tpu.memory_space<vmem>>, vector<8x128xf32>,
    %c0_48 = arith.constant 0 : index
    %c0_49 = arith.constant 0 : index
    %112 = vector.load %arg4[%c0_48, %c0_49] : memref<8x128xf32, #tpu.memory_space<vmem>>, vector<8x128xf32>
    tpu.vector_store %arg4[%c0_48, %c0_49], %52 {strides = array<i32>} : memref<8x128xf32, #tpu.memory_space<vmem>>, vector<8x128xf32>,
    return
  }
}

</mosaic_0001>

<bundles_post_ra>
// kernel: _fused_forward.1
= control target key start
LH: loop header
LB: loop body
LE: loop exit
PB: predicated region body
PF: predicated region fallthrough
CT: control target
= control target key end

     0   :  { %10 = vsyncpa [#allocation3], 0  ;;  %s1009_s0 = inlined_call_operand.vmem [shape: f32[8,128], index: 0, kind: input, shape index: {}]   ;;  %s1010_s1 = inlined_call_operand.hbm [shape: bf16[4,128,128], index: 1, kind: input, shape index: {}]   ;;  %s1011_s2 = inlined_call_operand.vmem [shape: f32[4,2,128], index: 2, kind: input, shape index: {}]   ;;  %s1012_s3 = inlined_call_operand.hbm [shape: f32[8,128], index: 3, kind: output, shape index: {0}]   ;;  %s1013_s4 = inlined_call_operand.hbm [shape: f32[8,128], index: 4, kind: output, shape index: {1}]  }
   0x1   :  { %11 = vsyncpa [#allocation4], 0 }
   0x2   :  { %12 = vsyncpa [#allocation7], 0  ;;  %s875_s15 = smov [#allocation2]   ;;  %s803_s19 = scalar_lea.hbm %s1010_s1, 4096 }
   0x3   :  { %s20_s16 = sshll.u32 %s875_s15, 4  ;;  %p804_p0 = scmp.ne.s32.totalorder %s1010_s1, %s803_s19  ;;  %s21_s16 = int_to_ptr.vmem [resolvable:$true] %s20_s16 }
   0x4   :  { %p807_p1 = scmp.lt.u32.totalorder %s803_s19, %s1010_s1 }
   0x6   :  { %p809_p2 = pnand %p807_p1, %p804_p0 }
   0x8   :  { %812 = shalt.err (!%p809_p2)
}
   0x9   :  { %s813_s24 = scalar_lea.vmem %s21_s16, 4096  ;;  %p818_p4 = scmp.lt.s32.totalorder %s21_s16, %s21_s16 }
   0xa   :  { %p814_p3 = scmp.ne.s32.totalorder %s21_s16, %s813_s24  ;;  %p819_p5 = scmp.lt.s32.totalorder %s813_s24, %s813_s24 }
   0xc   :  { %p820_p6 = por %p819_p5, %p818_p4 }
   0xe   :  { %p821_p7 = pnand %p820_p6, %p814_p3 }
  0x10   :  { %824 = shalt.err (!%p821_p7)
}
  0x11   :  { %s876_s25 = smov 64   ;;  %s877_s26 = smov 4  }
  0x12   :  { %26 = dma.hbm_to_vmem [thread:$0]  %s1010_s1, 4096, %s21_s16, [#allocation3], %s876_s25, %s876_s25, %s877_s26  }
  0x13   :  { %869 = dma.done.wait [#allocation3], 4096  }
  0x14   :  { %870 = vsyncadd [#allocation3], 4294963200  ;;  %v878_v0 = vmov 0.0   ;;  %vm879_vm0 = vmmov 0   ;;  %v761_v1 = vld [vmem:[#allocation2] sm:$0xff]   ;;  %v762_v2 = vld [vmem:[#allocation2 + $0x8] sm:$0xff]   ;;  %v160_v40 = vlaneseq }
  0x15   :  { %674 = vmatprep.subr.bf16.mxu0 %v878_v0  ;;  %690 = vmatprep.mubr.msk.bf16.mxu0 %vm879_vm0, %v878_v0  ;;  %v763_v3 = vld [vmem:[#allocation2 + $0x10] sm:$0xff]   ;;  %v764_v4 = vld [vmem:[#allocation2 + $0x18] sm:$0xff]   ;;  %v765_v5 = vld [vmem:[#allocation2 + $0x20] sm:$0xff]   ;;  %s880_s9 = smov [#allocation6]  }
  0x16   :  { %694 = vmatprep.subr.bf16.mxu1 %v878_v0  ;;  %710 = vmatprep.mubr.msk.bf16.mxu1 %vm879_vm0, %v878_v0  ;;  %v766_v6 = vld [vmem:[#allocation2 + $0x28] sm:$0xff]   ;;  %v767_v7 = vld [vmem:[#allocation2 + $0x30] sm:$0xff]   ;;  %v768_v8 = vld [vmem:[#allocation2 + $0x38] sm:$0xff]   ;;  %v161_v41 = vshrl.u32 %v160_v40, 7  ;;  %v284_v54 = vand.u32 127, %v160_v40  ;;  %s590_s10 = sshll.u32 %s880_s9, 4  ;;  %s591_s10 = int_to_ptr.vmem [resolvable:$true] %s590_s10 }
  0x17   :  { %675 = vmatpush3.bf16.msra.mxu0 %v761_v1  ;;  %v33_v9 = vld [vmem:[%s1009_s0] sm:$0xff]  ;;  %v770_v12 = vld [vmem:[#allocation2 + $0x48] sm:$0xff]   ;;  %v771_v13 = vld [vmem:[#allocation2 + $0x50] sm:$0xff]   ;;  %s825_s11 = scalar_lea.vmem %s591_s10, 128  ;;  %p830_p9 = scmp.lt.s32.totalorder %s591_s10, %s591_s10 }
  0x18   :  { %676 = vmatprep.subr.bf16.mxu0 %v878_v0  ;;  %v51_v10 = vpack.c.bf16 %v33_v9, %v33_v9  ;;  %v769_v11 = vld [vmem:[#allocation2 + $0x40] sm:$0xff]   ;;  %v772_v14 = vld [vmem:[#allocation2 + $0x58] sm:$0xff]   ;;  %v774_v16 = vld [vmem:[#allocation2 + $0x68] sm:$0xff]   ;;  %v949_v43 = vsub.s32 0, %v161_v41  ;;  %v951_v44 = vsub.s32 1, %v161_v41  ;;  %vm285_vm1 = vcmp.lt.s32.totalorder %v284_v54, 16  ;;  %p826_p8 = scmp.ne.s32.totalorder %s591_s10, %s825_s11  ;;  %p831_p10 = scmp.lt.s32.totalorder %s825_s11, %s825_s11 }
  0x19   :  { %695 = vmatpush3.bf16.msra.mxu1 %v769_v11  ;;  %v773_v15 = vld [vmem:[#allocation2 + $0x60] sm:$0xff]   ;;  %v775_v17 = vld [vmem:[#allocation2 + $0x70] sm:$0xff]   ;;  %v776_v18 = vld [vmem:[#allocation2 + $0x78] sm:$0xff]  }
  0x1a   :  { %696 = vmatprep.subr.bf16.mxu1 %v878_v0  ;;  %v50_v42 = vld [vmem:[%s1011_s2] sm:$0x3]  ;;  %v611_v53 = vld [vmem:[%s1011_s2 + $0x2] sm:$0x3]  ;;  %v778_v63 = vld [vmem:[#allocation2 + $0x88] sm:$0xff]   ;;  %p832_p11 = por %p831_p10, %p830_p9 }
  0x1b   :  { %677 = vmatpush3.bf16.msra.mxu0 %v762_v2  ;;  %v168_v48 = vrot.slane %v50_v42, %v951_v44  ;;  %v194_v55 = vrot.slane %v611_v53, %v949_v43  ;;  %v777_v62 = vld [vmem:[#allocation2 + $0x80] sm:$0xff]   ;;  %v779_v1 = vld [vmem:[#allocation2 + $0x90] sm:$0xff]   ;;  %v780_v2 = vld [vmem:[#allocation2 + $0x98] sm:$0xff]  }
  0x1c   :  { %678 = vmatprep.subr.bf16.mxu0 %v878_v0  ;;  %v783_v9 = vld [vmem:[#allocation2 + $0xb0] sm:$0xff]   ;;  %p833_p12 = pnand %p832_p11, %p826_p8 }
  0x1d   :  { %697 = vmatpush3.bf16.msra.mxu1 %v770_v12 }
  0x1e   :  { %698 = vmatprep.subr.bf16.mxu1 %v878_v0 }
  0x1f   :  { %679 = vmatpush3.bf16.msra.mxu0 %v763_v3 }
  0x20   :  { %680 = vmatprep.subr.bf16.mxu0 %v878_v0 }
  0x21   :  { %699 = vmatpush3.bf16.msra.mxu1 %v771_v13 }
  0x22   :  { %700 = vmatprep.subr.bf16.mxu1 %v878_v0 }
  0x23   :  { %681 = vmatpush3.bf16.msra.mxu0 %v764_v4 }
  0x24   :  { %682 = vmatprep.subr.bf16.mxu0 %v878_v0 }
  0x25   :  { %701 = vmatpush3.bf16.msra.mxu1 %v772_v14 }
  0x26   :  { %702 = vmatprep.subr.bf16.mxu1 %v878_v0 }
  0x27   :  { %683 = vmatpush3.bf16.msra.mxu0 %v765_v5 }
  0x28   :  { %684 = vmatprep.subr.bf16.mxu0 %v878_v0 }
  0x29   :  { %703 = vmatpush3.bf16.msra.mxu1 %v773_v15  ;;  %v785_v15 = vld [vmem:[#allocation2 + $0xc0] sm:$0xff]  }
  0x2a   :  { %704 = vmatprep.subr.bf16.mxu1 %v878_v0 }
  0x2b   :  { %685 = vmatpush3.bf16.msra.mxu0 %v766_v6 }
  0x2c   :  { %686 = vmatprep.subr.bf16.mxu0 %v878_v0 }
  0x2d   :  { %705 = vmatpush3.bf16.msra.mxu1 %v774_v16  ;;  %v786_v16 = vld [vmem:[#allocation2 + $0xc8] sm:$0xff]  }
  0x2e   :  { %706 = vmatprep.subr.bf16.mxu1 %v878_v0 }
  0x2f   :  { %687 = vmatpush3.bf16.msra.mxu0 %v767_v7  ;;  %v781_v7 = vld [vmem:[#allocation2 + $0xa0] sm:$0xff]  }
  0x30   :  { %688 = vmatprep.subr.bf16.mxu0 %v878_v0 }
  0x31   :  { %707 = vmatpush3.bf16.msra.mxu1 %v775_v17  ;;  %v787_v17 = vld [vmem:[#allocation2 + $0xd0] sm:$0xff]  }
  0x32   :  { %708 = vmatprep.subr.bf16.mxu1 %v878_v0 }
  0x33   :  { %689 = vmatpush3.bf16.msra.mxu0 %v768_v8  ;;  %v782_v8 = vld [vmem:[#allocation2 + $0xa8] sm:$0xff]  }
  0x34   :  { %714 = vmatprep.subr.bf16.mxu0 %v878_v0 }
  0x35   :  { %709 = vmatpush3.bf16.msra.mxu1 %v776_v18  ;;  %v788_v18 = vld [vmem:[#allocation2 + $0xd8] sm:$0xff]  }
  0x36   :  { %691 = vmatmul.mubr.bf16.vlgmr.msra.gmra.mrb[0].mxu0 %v51_v10  ;;  %734 = vmatprep.subr.bf16.mxu1 %v878_v0  ;;  %v784_v10 = vld [vmem:[#allocation2 + $0xb8] sm:$0xff]  }
  0x37   :  { %730 = vmatprep.mubr.msk.bf16.mxu0 %vm879_vm0, %v878_v0  ;;  %715 = vmatpush3.bf16.msra.mxu0 %v777_v62 }
  0x38   :  { %716 = vmatprep.subr.bf16.mxu0 %v878_v0 }
  0x3b   :  { %717 = vmatpush3.bf16.msra.mxu0 %v778_v63 }
  0x3c   :  { %718 = vmatprep.subr.bf16.mxu0 %v878_v0 }
  0x3f   :  { %719 = vmatpush3.bf16.msra.mxu0 %v779_v1 }
  0x40   :  { %720 = vmatprep.subr.bf16.mxu0 %v878_v0 }
  0x43   :  { %721 = vmatpush3.bf16.msra.mxu0 %v780_v2 }
  0x44   :  { %722 = vmatprep.subr.bf16.mxu0 %v878_v0 }
  0x47   :  { %723 = vmatpush3.bf16.msra.mxu0 %v781_v7 }
  0x48   :  { %724 = vmatprep.subr.bf16.mxu0 %v878_v0 }
  0x4b   :  { %725 = vmatpush3.bf16.msra.mxu0 %v782_v8 }
  0x4c   :  { %726 = vmatprep.subr.bf16.mxu0 %v878_v0 }
  0x4f   :  { %727 = vmatpush3.bf16.msra.mxu0 %v783_v9 }
  0x50   :  { %728 = vmatprep.subr.bf16.mxu0 %v878_v0 }
  0x53   :  { %729 = vmatpush3.bf16.msra.mxu0 %v784_v10 }
 0x109   :  { %v134_v19 = vpop.f32.mrb[0].mxu0 }
 0x10a   :  { %v140_v20 = vrot.slane %v134_v19, 4  ;;  %v692_v21 = vpop.f32.mrb[1].mxu0 }
 0x10b   :  { %v137_v22 = vpop.f32.mrb[2].mxu0  ;;  %v791_v21 = vld [vmem:[#allocation2 + $0xf0] sm:$0xff]  }
 0x10c   :  { %v141_v23 = vadd.f32 %v140_v20, %v134_v19  ;;  %v693_v24 = vpop.f32.mrb[3].mxu0  ;;  %v790_v20 = vld [vmem:[#allocation2 + $0xe8] sm:$0xff]   ;;  %v792_v22 = vld [vmem:[#allocation2 + $0xf8] sm:$0xff]  }
 0x10e   :  { %v142_v25 = vrot.slane %v141_v23, 2 }
 0x110   :  { %v143_v26 = vadd.f32 %v142_v25, %v141_v23 }
 0x112   :  { %v144_v27 = vrot.slane %v143_v26, 1 }
 0x114   :  { %v145_v28 = vadd.f32 %v144_v27, %v143_v26 }
 0x116   :  { %v147_v29 = vmul.f32 0.125, %v145_v28 }
 0x118   :  { %v148_v30 = vsub.f32 %v134_v19, %v147_v29  ;;  %v789_v19 = vld [vmem:[#allocation2 + $0xe0] sm:$0xff]  }
 0x11a   :  { %v149_v31 = vmul.f32 %v148_v30, %v148_v30 }
 0x11c   :  { %v150_v32 = vrot.slane %v149_v31, 4 }
 0x11e   :  { %v151_v33 = vadd.f32 %v150_v32, %v149_v31 }
 0x120   :  { %v152_v34 = vrot.slane %v151_v33, 2 }
 0x122   :  { %v153_v35 = vadd.f32 %v152_v34, %v151_v33 }
 0x124   :  { %v154_v36 = vrot.slane %v153_v35, 1 }
 0x126   :  { %v155_v37 = vadd.f32 %v154_v36, %v153_v35 }
 0x128   :  { %v156_v38 = vmul.f32 0.125, %v155_v37 }
 0x12a   :  { %v157_v39 = vadd.f32 1e-05, %v156_v38 }
 0x12c   :  { %793 = vrsqrt.f32 %v157_v39 }
 0x136   :  { %v794_v45 = vpop.eup %793 }
 0x137   :  { %v159_v46 = vmul.f32 %v794_v45, %v50_v42  ;;  %v620_v45 = vld [vmem:[%s1011_s2 + $0x4] sm:$0x3] }
 0x139   :  { %v163_v47 = vrot.slane %v159_v46, %v949_v43 }
 0x13b   :  { %v164_v49 = vmul.f32 %v163_v47, %v148_v30 }
 0x13d   :  { %v169_v50 = vadd.f32 %v168_v48, %v164_v49  ;;  %v431_v49 = vrot.slane %v620_v45, %v951_v44 }
 0x13f   :  { %v170_v51 = vmax.f32 %v169_v50, 0.0 }
 0x141   :  { %v190_v52 = vpack.c.bf16 %v170_v51, %v170_v51 }
 0x143   :  { %711 = vmatmul.mubr.bf16.vlgmr.msra.gmra.mrb[0].mxu1 %v190_v52 }
 0x144   :  { %750 = vmatprep.mubr.msk.bf16.mxu1 %vm879_vm0, %v878_v0  ;;  %735 = vmatpush3.bf16.msra.mxu1 %v785_v15 }
 0x145   :  { %736 = vmatprep.subr.bf16.mxu1 %v878_v0 }
 0x148   :  { %737 = vmatpush3.bf16.msra.mxu1 %v786_v16 }
 0x149   :  { %738 = vmatprep.subr.bf16.mxu1 %v878_v0 }
 0x14c   :  { %739 = vmatpush3.bf16.msra.mxu1 %v787_v17 }
 0x14d   :  { %740 = vmatprep.subr.bf16.mxu1 %v878_v0 }
 0x150   :  { %741 = vmatpush3.bf16.msra.mxu1 %v788_v18 }
 0x151   :  { %742 = vmatprep.subr.bf16.mxu1 %v878_v0 }
 0x154   :  { %743 = vmatpush3.bf16.msra.mxu1 %v789_v19 }
 0x155   :  { %744 = vmatprep.subr.bf16.mxu1 %v878_v0 }
 0x158   :  { %745 = vmatpush3.bf16.msra.mxu1 %v790_v20 }
 0x159   :  { %746 = vmatprep.subr.bf16.mxu1 %v878_v0 }
 0x15c   :  { %747 = vmatpush3.bf16.msra.mxu1 %v791_v21 }
 0x15d   :  { %748 = vmatprep.subr.bf16.mxu1 %v878_v0 }
 0x160   :  { %749 = vmatpush3.bf16.msra.mxu1 %v792_v22 }
 0x216   :  { %v277_v56 = vpop.f32.mrb[0].mxu1 }
 0x217   :  { %v278_v57 = vadd.f32 %v277_v56, %v194_v55  ;;  %v712_v58 = vpop.f32.mrb[1].mxu1 }
 0x218   :  { %v280_v59 = vpop.f32.mrb[2].mxu1 }
 0x219   :  { %v713_v60 = vpop.f32.mrb[3].mxu1  ;;  %v286_v61 = vsel %vm285_vm1, %v278_v57, -inf }
 0x21a   :  { %287 = vmax.xlane.f32.xlu0 %v286_v61 }
 0x2a7   :  { %v288_v3 = vpop.xlane.xlu0 %287 }
 0x2a8   :  { %v289_v4 = vsub.f32 %v286_v61, %v288_v3 }
 0x2aa   :  { %v290_v5 = vmul.f32 1.442695, %v289_v4 }
 0x2ac   :  { %795 = vpow2.f32 %v290_v5 }
 0x2b6   :  { %v796_v6 = vpop.eup %795 }
 0x2b7   :  { %292 = vadd.xlane.f32.xlu0 %v796_v6 }
 0x344   :  { %v293_v11 = vpop.xlane.xlu0 %292 }
 0x345   :  { %797 = vrcp.f32 %v293_v11 }
 0x34f   :  { %v798_v12 = vpop.eup %797 }
 0x350   :  { %v295_v13 = vmul.f32 %v798_v12, %v796_v6 }
 0x352   :  { %v315_v14 = vpack.c.bf16 %v295_v13, %v295_v13  ;;  %573 = vst [vmem:[#allocation6] sm:$0xff] %v295_v13 }
 0x354   :  { %731 = vmatmul.mubr.bf16.vlgmr.msra.gmra.mrb[4].mxu0 %v315_v14 }
 0x427   :  { %v398_v23 = vpop.f32.mrb[4].mxu0 }
 0x428   :  { %v404_v24 = vrot.slane %v398_v23, 4  ;;  %v732_v25 = vpop.f32.mrb[5].mxu0 }
 0x429   :  { %v401_v26 = vpop.f32.mrb[6].mxu0 }
 0x42a   :  { %v405_v27 = vadd.f32 %v404_v24, %v398_v23  ;;  %v733_v28 = vpop.f32.mrb[7].mxu0 }
 0x42c   :  { %v406_v29 = vrot.slane %v405_v27, 2 }
 0x42e   :  { %v407_v30 = vadd.f32 %v406_v29, %v405_v27 }
 0x430   :  { %v408_v31 = vrot.slane %v407_v30, 1 }
 0x432   :  { %v409_v32 = vadd.f32 %v408_v31, %v407_v30 }
 0x434   :  { %v410_v33 = vmul.f32 0.125, %v409_v32 }
 0x436   :  { %v411_v34 = vsub.f32 %v398_v23, %v410_v33 }
 0x438   :  { %v412_v35 = vmul.f32 %v411_v34, %v411_v34 }
 0x43a   :  { %v413_v36 = vrot.slane %v412_v35, 4 }
 0x43c   :  { %v414_v37 = vadd.f32 %v413_v36, %v412_v35 }
 0x43e   :  { %v415_v38 = vrot.slane %v414_v37, 2 }
 0x440   :  { %v416_v39 = vadd.f32 %v415_v38, %v414_v37 }
 0x442   :  { %v417_v0 = vrot.slane %v416_v39, 1 }
 0x444   :  { %v418_v40 = vadd.f32 %v417_v0, %v416_v39 }
 0x446   :  { %v419_v41 = vmul.f32 0.125, %v418_v40 }
 0x448   :  { %v420_v42 = vadd.f32 1e-05, %v419_v41 }
 0x44a   :  { %799 = vrsqrt.f32 %v420_v42 }
 0x454   :  { %v800_v46 = vpop.eup %799 }
 0x455   :  { %v422_v47 = vmul.f32 %v800_v46, %v620_v45 }
 0x457   :  { %v426_v48 = vrot.slane %v422_v47, %v949_v43 }
 0x459   :  { %v427_v50 = vmul.f32 %v426_v48, %v411_v34 }
 0x45b   :  { %v432_v51 = vadd.f32 %v431_v49, %v427_v50 }
 0x45d   :  { %v433_v52 = vmax.f32 %v432_v51, 0.0 }
 0x45f   :  { %v453_v53 = vpack.c.bf16 %v433_v52, %v433_v52 }
 0x461   :  { %751 = vmatmul.mubr.bf16.vlgmr.msra.gmra.mrb[4].mxu1 %v453_v53 }
 0x462   :  { %836 = shalt.err (!%p833_p12)
}
 0x463   :  { %s837_s14 = scalar_lea.hbm %s1013_s4, 128 }
 0x464   :  { %p838_p13 = scmp.ne.s32.totalorder %s1013_s4, %s837_s14  ;;  %p841_p0 = scmp.lt.u32.totalorder %s837_s14, %s1013_s4 }
 0x466   :  { %p843_p1 = pnand %p841_p0, %p838_p13 }
 0x468   :  { %846 = shalt.err (!%p843_p1)
}
 0x469   :  { %593 = dma.vmem_to_hbm [thread:$0]  %s591_s10, 128, %s1013_s4, [#allocation7]   ;;  %v629_v12 = vld [vmem:[%s1011_s2 + $0x6] sm:$0x3] }
 0x46a   :  { %v569_v16 = vrot.slane %v629_v12, %v951_v44  ;;  %s881_s22 = smov [#allocation5]  }
 0x46b   :  { %s580_s23 = sshll.u32 %s881_s22, 4  ;;  %s581_s23 = int_to_ptr.vmem [resolvable:$true] %s580_s23 }
 0x46c   :  { %s847_s24 = scalar_lea.vmem %s581_s23, 128  ;;  %p852_p3 = scmp.lt.s32.totalorder %s581_s23, %s581_s23 }
 0x46d   :  { %p848_p2 = scmp.ne.s32.totalorder %s581_s23, %s847_s24  ;;  %p853_p4 = scmp.lt.s32.totalorder %s847_s24, %s847_s24 }
 0x46f   :  { %p854_p5 = por %p853_p4, %p852_p3 }
 0x471   :  { %p855_p6 = pnand %p854_p5, %p848_p2 }
 0x534   :  { %v536_v54 = vpop.f32.mrb[4].mxu1 }
 0x535   :  { %v542_v55 = vrot.slane %v536_v54, 4  ;;  %v752_v56 = vpop.f32.mrb[5].mxu1 }
 0x536   :  { %v539_v57 = vpop.f32.mrb[6].mxu1 }
 0x537   :  { %v543_v58 = vadd.f32 %v542_v55, %v536_v54  ;;  %v753_v59 = vpop.f32.mrb[7].mxu1 }
 0x539   :  { %v544_v60 = vrot.slane %v543_v58, 2 }
 0x53b   :  { %v545_v61 = vadd.f32 %v544_v60, %v543_v58 }
 0x53d   :  { %v546_v62 = vrot.slane %v545_v61, 1 }
 0x53f   :  { %v547_v63 = vadd.f32 %v546_v62, %v545_v61 }
 0x541   :  { %v548_v1 = vmul.f32 0.125, %v547_v63 }
 0x543   :  { %v549_v2 = vsub.f32 %v536_v54, %v548_v1 }
 0x545   :  { %v550_v3 = vmul.f32 %v549_v2, %v549_v2 }
 0x547   :  { %v551_v4 = vrot.slane %v550_v3, 4 }
 0x549   :  { %v552_v5 = vadd.f32 %v551_v4, %v550_v3 }
 0x54b   :  { %v553_v6 = vrot.slane %v552_v5, 2 }
 0x54d   :  { %v554_v7 = vadd.f32 %v553_v6, %v552_v5 }
 0x54f   :  { %v555_v8 = vrot.slane %v554_v7, 1 }
 0x551   :  { %v556_v9 = vadd.f32 %v555_v8, %v554_v7 }
 0x553   :  { %v557_v10 = vmul.f32 0.125, %v556_v9 }
 0x555   :  { %v558_v11 = vadd.f32 1e-05, %v557_v10 }
 0x557   :  { %801 = vrsqrt.f32 %v558_v11 }
 0x561   :  { %v802_v13 = vpop.eup %801 }
 0x562   :  { %v560_v14 = vmul.f32 %v802_v13, %v629_v12 }
 0x564   :  { %v564_v15 = vrot.slane %v560_v14, %v949_v43 }
 0x566   :  { %v565_v17 = vmul.f32 %v564_v15, %v549_v2 }
 0x568   :  { %v570_v18 = vadd.f32 %v569_v16, %v565_v17 }
 0x56a   :  { %v571_v19 = vmax.f32 %v570_v18, 0.0 }
 0x56c   :  { %572 = vst [vmem:[#allocation5] sm:$0xff] %v571_v19 }
 0x56d   :  { %858 = shalt.err (!%p855_p6)
}
 0x56e   :  { %s859_s26 = scalar_lea.hbm %s1012_s3, 128 }
 0x56f   :  { %p860_p7 = scmp.ne.s32.totalorder %s1012_s3, %s859_s26  ;;  %p863_p8 = scmp.lt.u32.totalorder %s859_s26, %s1012_s3 }
 0x571   :  { %p865_p9 = pnand %p863_p8, %p860_p7 }
 0x573   :  { %868 = shalt.err (!%p865_p9)
}
 0x574   :  { %583 = dma.vmem_to_hbm [thread:$0]  %s581_s23, 128, %s1012_s3, [#allocation4]  }
 0x575   :  { %871 = dma.done.wait [#allocation4], 128  }
 0x576   :  { %872 = vsyncadd [#allocation4], 4294967168 }
 0x577   :  { %873 = dma.done.wait [#allocation7], 128  }
 0x578   :  { %874 = vsyncadd [#allocation7], 4294967168 }
 0x579   :  { %600 = vsyncpa [#allocation3], 1 }
 0x57a   :  { %601 = vsyncpa [#allocation4], 1 }
 0x57b   :  { %602 = vsyncpa [#allocation7], 1 }

</bundles_post_ra>
